<compile_context>
chip_gen: v7x
topology: tpu7x:2x2x1
jax: 0.10.0
libtpu: 0.0.40
codegen_flags: <defaults>
</compile_context>

<pallas_src>
import functools

import jax
import jax.numpy as jnp
from jax.experimental import pallas as pl
from jax.experimental.pallas import tpu as pltpu

LANES = 128
SUBLANES = 8
TILE_ROWS = 1024  # (1024, 128) f32 block = 512 KiB; 2 inputs x 2 buffers = 2 MiB resident


def _focal_loss_kernel(x_ref, t_ref, out_ref, *, gamma, rem_last, block_elems):
    i = pl.program_id(0)

    x = x_ref[...].astype(jnp.float32)
    t = t_ref[...].astype(jnp.float32)

    # BCE with logits (stable):
    #   x - x*t + max(-x,0) + log(exp(-max) + exp(-x-max)) == x - x*t + softplus(-x)
    #   softplus(-x) = max(-x, 0) + log(1 + exp(-|x|))
    e_x = jnp.exp(-jnp.abs(x))                                       # 1 exp
    loss = x - x * t + jnp.maximum(-x, 0.0) + jnp.log(1.0 + e_x)     # 1 log

    # Focal factor: exp(gamma * logsigmoid(z)),  z = -x * (2t - 1)
    z = -x * (t * 2.0 - 1.0)
    e_z = jnp.exp(-jnp.abs(z))                                       # 1 exp
    g_int = int(gamma)
    if float(gamma) == float(g_int) and 0 <= g_int <= 8:
        # sigmoid(z)**gamma by repeated multiplies: saves a log and an exp.
        inv = 1.0 / (1.0 + e_z)
        sig = jnp.where(z >= 0.0, inv, e_z * inv)
        if g_int == 0:
            factor = jnp.ones_like(loss)
        else:
            factor = sig
            for _ in range(g_int - 1):
                factor = factor * sig
    else:
        invprobs = -(jnp.maximum(-z, 0.0) + jnp.log(1.0 + e_z))
        factor = jnp.exp(invprobs * gamma)

    loss = factor * loss

    def _store(v):
        r, c = v.shape
        # (tile_rows, 128) -> (tile_rows//8, 8, 128) -> sum over leading axis:
        # pure vreg adds on the VPU; no cross-lane (XLU) reduction in the loop.
        out_ref[...] = v.reshape(r // SUBLANES, SUBLANES, c).sum(axis=0, keepdims=True)

    if rem_last < block_elems:
        # Padding / partial data lives only in the last grid block.
        last = pl.num_programs(0) - 1

        @pl.when(i != last)
        def _():
            _store(loss)

        @pl.when(i == last)
        def _():
            r, c = loss.shape
            idx = (jax.lax.broadcasted_iota(jnp.int32, (r, c), 0) * c
                   + jax.lax.broadcasted_iota(jnp.int32, (r, c), 1))
            _store(jnp.where(idx < rem_last, loss, 0.0))
    else:
        _store(loss)


def focal_loss(logits, targets, gamma):
    if logits.shape != targets.shape:
        raise ValueError(
            "Target size ({}) must be the same as input size ({})".format(
                targets.shape, logits.shape))
    n = logits.size
    if n >= 2 ** 31:
        raise ValueError("focal_loss kernel supports < 2**31 elements (int32 indexing)")

    x = jnp.ravel(logits)   # keep original dtypes: no wrapper up-cast
    t = jnp.ravel(targets)

    # Pad only up to one (8, 128) vreg tile; skipped entirely when aligned.
    tile_elems = SUBLANES * LANES
    n_pad = pl.cdiv(n, tile_elems) * tile_elems
    if n_pad != n:
        x = jnp.pad(x, (0, n_pad - n))
        t = jnp.pad(t, (0, n_pad - n))
    rows = n_pad // LANES
    x2 = x.reshape(rows, LANES)
    t2 = t.reshape(rows, LANES)

    tile_rows = min(TILE_ROWS, rows)          # rows is a multiple of 8
    grid = pl.cdiv(rows, tile_rows)
    block_elems = tile_rows * LANES
    rem_last = n - (grid - 1) * block_elems   # valid elements in the last block

    kernel = functools.partial(
        _focal_loss_kernel, gamma=float(gamma),
        rem_last=int(rem_last), block_elems=int(block_elems))

    out_bytes = grid * SUBLANES * LANES * 4
    cost = pl.CostEstimate(
        flops=20 * n,
        transcendentals=4 * n,
        bytes_accessed=int(x2.size * x2.dtype.itemsize
                           + t2.size * t2.dtype.itemsize + out_bytes))

    partials = pl.pallas_call(
        kernel,
        out_shape=jax.ShapeDtypeStruct((grid, SUBLANES, LANES), jnp.float32),
        grid_spec=pltpu.PrefetchScalarGridSpec(
            num_scalar_prefetch=0,
            grid=(grid,),
            in_specs=[
                pl.BlockSpec((tile_rows, LANES), lambda i: (i, 0)),
                pl.BlockSpec((tile_rows, LANES), lambda i: (i, 0)),
            ],
            out_specs=pl.BlockSpec((1, SUBLANES, LANES), lambda i: (i, 0, 0)),
        ),
        compiler_params=pltpu.CompilerParams(
            dimension_semantics=("parallel",)),
        cost_estimate=cost,
    )(x2, t2)

    # Tiny final reduction (grid * 1024 floats) + mean in plain XLA.
    return jnp.sum(partials) / jnp.float32(n)


def focal_loss_ref(x, t, gamma):
    x = x.astype(jnp.float32)
    t = t.astype(jnp.float32)
    max_val = jnp.maximum(-x, 0.0)
    loss = x - x * t + max_val + jnp.log(jnp.exp(-max_val) + jnp.exp(-x - max_val))
    invprobs = jax.nn.log_sigmoid(-x * (t * 2.0 - 1.0))
    loss = jnp.exp(invprobs * gamma) * loss
    return jnp.mean(loss)


if __name__ == "__main__":
    key = jax.random.PRNGKey(0)
    k1, k2, k3, k4 = jax.random.split(key, 4)

    # Main case: NCHW logits / binary targets, integer gamma (fast focal path).
    x = jax.random.normal(k1, (2, 4, 16, 16), dtype=jnp.float32) * 3.0
    t = (jax.random.uniform(k2, (2, 4, 16, 16)) > 0.5).astype(jnp.float32)
    out = focal_loss(x, t, 2.0)
    jax.block_until_ready(out)
    ref = focal_loss_ref(x, t, 2.0)
    assert jnp.allclose(out, ref, rtol=1e-5, atol=1e-5), (out, ref)

    # Ragged size + non-integer gamma: exercises the padded-tail mask and the
    # general exp(gamma * logsigmoid) path.
    x2 = jax.random.normal(k3, (3, 5, 7, 11), dtype=jnp.float32) * 2.0
    t2 = (jax.random.uniform(k4, (3, 5, 7, 11)) > 0.5).astype(jnp.float32)
    out2 = focal_loss(x2, t2, 2.5)
    jax.block_until_ready(out2)
    ref2 = focal_loss_ref(x2, t2, 2.5)
    assert jnp.allclose(out2, ref2, rtol=1e-5, atol=1e-5), (out2, ref2)

    print("KERNEL_OK")
</pallas_src>

<mosaic_0001>
module attributes {stable_mosaic.version = 11 : i64} {
  func.func @_focal_loss_kernel(%arg0: i32, %arg1: memref<16x128xf32, #tpu.memory_space<vmem>>, %arg2: memref<16x128xf32, #tpu.memory_space<vmem>>, %arg3: memref<1x8x128xf32, #tpu.memory_space<vmem>>) attributes {dimension_semantics = [#tpu.dimension_semantics<parallel>], iteration_bounds = array<i64: 1>, scalar_prefetch = 0 : i64, scratch_operands = 0 : i64, tpu.core_type = #tpu.core_type<tc>, window_params = [{transform_indices = @transform_0, window_bounds = array<i64: 16, 128>}, {transform_indices = @transform_1, window_bounds = array<i64: 16, 128>}, {transform_indices = @transform_2, window_bounds = array<i64: 1, 8, 128>}]} {
    %c0 = arith.constant 0 : index
    %c0_0 = arith.constant 0 : index
    %0 = vector.load %arg1[%c0, %c0_0] : memref<16x128xf32, #tpu.memory_space<vmem>>, vector<16x128xf32>
    %c0_1 = arith.constant 0 : index
    %c0_2 = arith.constant 0 : index
    %1 = vector.load %arg2[%c0_1, %c0_2] : memref<16x128xf32, #tpu.memory_space<vmem>>, vector<16x128xf32>
    %2 = math.absf %0 : vector<16x128xf32>
    %cst = arith.constant 0.000000e+00 : f32
    %3 = vector.broadcast %cst : f32 to vector<16x128xf32>
    %4 = arith.subf %3, %2 : vector<16x128xf32>
    %5 = math.exp %4 : vector<16x128xf32>
    %6 = arith.mulf %0, %1 : vector<16x128xf32>
    %7 = arith.subf %0, %6 : vector<16x128xf32>
    %cst_3 = arith.constant 0.000000e+00 : f32
    %8 = vector.broadcast %cst_3 : f32 to vector<16x128xf32>
    %9 = arith.subf %8, %0 : vector<16x128xf32>
    %cst_4 = arith.constant 0.000000e+00 : f32
    %10 = vector.broadcast %cst_4 : f32 to vector<16x128xf32>
    %11 = arith.maximumf %9, %10 : vector<16x128xf32>
    %12 = arith.addf %7, %11 : vector<16x128xf32>
    %cst_5 = arith.constant 1.000000e+00 : f32
    %13 = vector.broadcast %cst_5 : f32 to vector<16x128xf32>
    %14 = arith.addf %13, %5 : vector<16x128xf32>
    %15 = math.log %14 : vector<16x128xf32>
    %16 = arith.addf %12, %15 : vector<16x128xf32>
    %cst_6 = arith.constant 0.000000e+00 : f32
    %17 = vector.broadcast %cst_6 : f32 to vector<16x128xf32>
    %18 = arith.subf %17, %0 : vector<16x128xf32>
    %cst_7 = arith.constant 2.000000e+00 : f32
    %19 = vector.broadcast %cst_7 : f32 to vector<16x128xf32>
    %20 = arith.mulf %1, %19 : vector<16x128xf32>
    %cst_8 = arith.constant 1.000000e+00 : f32
    %21 = vector.broadcast %cst_8 : f32 to vector<16x128xf32>
    %22 = arith.subf %20, %21 : vector<16x128xf32>
    %23 = arith.mulf %18, %22 : vector<16x128xf32>
    %24 = math.absf %23 : vector<16x128xf32>
    %cst_9 = arith.constant 0.000000e+00 : f32
    %25 = vector.broadcast %cst_9 : f32 to vector<16x128xf32>
    %26 = arith.subf %25, %24 : vector<16x128xf32>
    %27 = math.exp %26 : vector<16x128xf32>
    %cst_10 = arith.constant 1.000000e+00 : f32
    %28 = vector.broadcast %cst_10 : f32 to vector<16x128xf32>
    %29 = arith.addf %28, %27 : vector<16x128xf32>
    %cst_11 = arith.constant 1.000000e+00 : f32
    %30 = vector.broadcast %cst_11 : f32 to vector<16x128xf32>
    %31 = arith.divf %30, %29 : vector<16x128xf32>
    %cst_12 = arith.constant 0.000000e+00 : f32
    %32 = vector.broadcast %cst_12 : f32 to vector<16x128xf32>
    %33 = arith.cmpf oge, %23, %32 : vector<16x128xf32>
    %34 = arith.mulf %27, %31 : vector<16x128xf32>
    %35 = arith.select %33, %31, %34 : vector<16x128xi1>, vector<16x128xf32>
    %36 = arith.mulf %35, %35 : vector<16x128xf32>
    %37 = arith.mulf %36, %16 : vector<16x128xf32>
    %38 = vector.shape_cast %37 : vector<16x128xf32> to vector<2x8x128xf32>
    %cst_13 = arith.constant dense<0.000000e+00> : vector<8x128xf32>
    %39 = vector.multi_reduction <add>, %38, %cst_13 [0] : vector<2x8x128xf32> to vector<8x128xf32>
    %40 = vector.shape_cast %39 : vector<8x128xf32> to vector<1x8x128xf32>
    %c0_14 = arith.constant 0 : index
    %c0_15 = arith.constant 0 : index
    %c0_16 = arith.constant 0 : index
    %41 = vector.load %arg3[%c0_14, %c0_15, %c0_16] : memref<1x8x128xf32, #tpu.memory_space<vmem>>, vector<1x8x128xf32>
    tpu.vector_store %arg3[%c0_14, %c0_15, %c0_16], %40 {strides = array<i32>} : memref<1x8x128xf32, #tpu.memory_space<vmem>>, vector<1x8x128xf32>,
    return
  }
  func.func @transform_0(%arg0: i32) -> (i32, i32) {
    %c0_i32 = arith.constant 0 : i32
    %c0_i32_0 = arith.constant 0 : i32
    return %arg0, %c0_i32 : i32, i32
  }
  func.func @transform_1(%arg0: i32) -> (i32, i32) {
    %c0_i32 = arith.constant 0 : i32
    %c0_i32_0 = arith.constant 0 : i32
    return %arg0, %c0_i32 : i32, i32
  }
  func.func @transform_2(%arg0: i32) -> (i32, i32, i32) {
    %c0_i32 = arith.constant 0 : i32
    %c0_i32_0 = arith.constant 0 : i32
    %c0_i32_1 = arith.constant 0 : i32
    return %arg0, %c0_i32, %c0_i32_0 : i32, i32, i32
  }
}

</mosaic_0001>

<bundles_post_ra>
// kernel: tpu_custom_call.1
= control target key start
LH: loop header
LB: loop body
LE: loop exit
PB: predicated region body
PF: predicated region fallthrough
CT: control target
= control target key end

     0   :  { %7 = vsyncpa [#allocation3], 0  ;;  %s269_s0 = inlined_call_operand.hbm [shape: f32[16,128], index: 0, kind: input, shape index: {}]   ;;  %s270_s1 = inlined_call_operand.hbm [shape: f32[16,128], index: 1, kind: input, shape index: {}]   ;;  %s271_s2 = inlined_call_operand.hbm [shape: f32[1,8,128], index: 2, kind: output, shape index: {}]  }
   0x1   :  { %8 = vsyncpa [#allocation6], 0 }
   0x2   :  { %9 = vsyncpa [#allocation4], 0  ;;  %s213_s9 = smov [#allocation2]   ;;  %s141_s13 = scalar_lea.hbm %s269_s0, 256 }
   0x3   :  { %s15_s10 = sshll.u32 %s213_s9, 4  ;;  %p142_p0 = scmp.ne.s32.totalorder %s269_s0, %s141_s13  ;;  %s16_s10 = int_to_ptr.vmem [resolvable:$true] %s15_s10 }
   0x4   :  { %p145_p1 = scmp.lt.u32.totalorder %s141_s13, %s269_s0 }
   0x6   :  { %p147_p2 = pnand %p145_p1, %p142_p0 }
   0x8   :  { %150 = shalt.err (!%p147_p2)
}
   0x9   :  { %s151_s18 = scalar_lea.vmem %s16_s10, 256  ;;  %p156_p4 = scmp.lt.s32.totalorder %s16_s10, %s16_s10 }
   0xa   :  { %p152_p3 = scmp.ne.s32.totalorder %s16_s10, %s151_s18  ;;  %p157_p5 = scmp.lt.s32.totalorder %s151_s18, %s151_s18 }
   0xc   :  { %p158_p6 = por %p157_p5, %p156_p4 }
   0xe   :  { %p159_p7 = pnand %p158_p6, %p152_p3 }
  0x10   :  { %162 = shalt.err (!%p159_p7)
}
  0x11   :  { %s214_s19 = smov 128   ;;  %s215_s20 = smov 8  }
  0x12   :  { %21 = dma.hbm_to_vmem [thread:$0]  %s269_s0, 256, %s16_s10, [#allocation3], %s214_s19, %s214_s19, %s215_s20  }
  0x13   :  { %s216_s23 = smov [#allocation5]   ;;  %s163_s27 = scalar_lea.hbm %s270_s1, 256 }
  0x14   :  { %s27_s24 = sshll.u32 %s216_s23, 4  ;;  %p164_p8 = scmp.ne.s32.totalorder %s270_s1, %s163_s27  ;;  %s28_s24 = int_to_ptr.vmem [resolvable:$true] %s27_s24 }
  0x15   :  { %p167_p9 = scmp.lt.u32.totalorder %s163_s27, %s270_s1 }
  0x17   :  { %p169_p10 = pnand %p167_p9, %p164_p8 }
  0x19   :  { %172 = shalt.err (!%p169_p10)
}
  0x1a   :  { %s173_s4 = scalar_lea.vmem %s28_s24, 256  ;;  %p178_p12 = scmp.lt.s32.totalorder %s28_s24, %s28_s24 }
  0x1b   :  { %p174_p11 = scmp.ne.s32.totalorder %s28_s24, %s173_s4  ;;  %p179_p13 = scmp.lt.s32.totalorder %s173_s4, %s173_s4 }
  0x1d   :  { %p180_p0 = por %p179_p13, %p178_p12 }
  0x1f   :  { %p181_p1 = pnand %p180_p0, %p174_p11 }
  0x21   :  { %184 = shalt.err (!%p181_p1)
}
  0x22   :  { %33 = dma.hbm_to_vmem [thread:$0]  %s270_s1, 256, %s28_s24, [#allocation6], %s214_s19, %s214_s19, %s215_s20  }
  0x23   :  { %207 = dma.done.wait [#allocation3], 256  }
  0x24   :  { %208 = vsyncadd [#allocation3], 4294967040 }
  0x25   :  { %209 = dma.done.wait [#allocation6], 256  }
  0x26   :  { %210 = vsyncadd [#allocation6], 4294967040  ;;  %v40_v0 = vld [vmem:[#allocation2] sm:$0xff]  ;;  %v41_v1 = vld [vmem:[#allocation2 + $0x8] sm:$0xff]  ;;  %s217_s1 = smov [#allocation7]  }
  0x27   :  { %v42_v2 = vld [vmem:[#allocation5] sm:$0xff]  ;;  %v43_v3 = vld [vmem:[#allocation5 + $0x8] sm:$0xff]  ;;  %v44_v4 = vand.u32 2147483647, %v40_v0  ;;  %v45_v5 = vand.u32 2147483647, %v41_v1 }
  0x28   :  { %v56_v6 = vsub.f32 0.0, %v40_v0  ;;  %v57_v7 = vsub.f32 0.0, %v41_v1  ;;  %v70_v8 = vmul.f32 2.0, %v42_v2  ;;  %v71_v9 = vmul.f32 2.0, %v43_v3  ;;  %s108_s6 = sshll.u32 %s217_s1, 4  ;;  %s109_s6 = int_to_ptr.vmem [resolvable:$true] %s108_s6 }
  0x29   :  { %v46_v10 = vsub.f32 0.0, %v44_v4  ;;  %v47_v11 = vsub.f32 0.0, %v45_v5  ;;  %v52_v32 = vmul.f32 %v42_v2, %v40_v0  ;;  %v53_v33 = vmul.f32 %v43_v3, %v41_v1  ;;  %s185_s7 = scalar_lea.vmem %s109_s6, 128  ;;  %p190_p3 = scmp.lt.s32.totalorder %s109_s6, %s109_s6 }
  0x2a   :  { %v118_v12 = vadd.f32 -1.0, %v70_v8  ;;  %v119_v13 = vadd.f32 -1.0, %v71_v9  ;;  %v58_v35 = vmax.f32 %v56_v6, 0.0  ;;  %v59_v38 = vmax.f32 %v57_v7, 0.0  ;;  %p186_p2 = scmp.ne.s32.totalorder %s109_s6, %s185_s7  ;;  %p191_p4 = scmp.lt.s32.totalorder %s185_s7, %s185_s7 }
  0x2b   :  { %v48_v14 = vmul.f32 1.442695, %v46_v10  ;;  %v50_v15 = vmul.f32 1.442695, %v47_v11  ;;  %v54_v34 = vsub.f32 %v40_v0, %v52_v32  ;;  %v55_v37 = vsub.f32 %v41_v1, %v53_v33 }
  0x2c   :  { %v74_v16 = vmul.f32 %v118_v12, %v56_v6  ;;  %v75_v17 = vmul.f32 %v119_v13, %v57_v7  ;;  %p192_p5 = por %p191_p4, %p190_p3 }
  0x2d   :  { %125 = vpow2.f32 %v48_v14  ;;  %v60_v40 = vadd.f32 %v58_v35, %v54_v34  ;;  %v61_v42 = vadd.f32 %v59_v38, %v55_v37 }
  0x2e   :  { %127 = vpow2.f32 %v50_v15  ;;  %v76_v18 = vand.u32 2147483647, %v74_v16  ;;  %v77_v19 = vand.u32 2147483647, %v75_v17  ;;  %vm90_vm0 = vcmp.ge.f32.partialorder %v74_v16, 0.0  ;;  %p193_p6 = pnand %p192_p5, %p186_p2 }
  0x2f   :  { %vm91_vm1 = vcmp.ge.f32.partialorder %v75_v17, 0.0 }
  0x30   :  { %v78_v20 = vsub.f32 0.0, %v76_v18  ;;  %v79_v21 = vsub.f32 0.0, %v77_v19 }
  0x32   :  { %v80_v22 = vmul.f32 1.442695, %v78_v20  ;;  %v82_v23 = vmul.f32 1.442695, %v79_v21 }
  0x34   :  { %129 = vpow2.f32 %v80_v22 }
  0x35   :  { %131 = vpow2.f32 %v82_v23 }
  0x37   :  { %v126_v24 = vpop.eup %125 }
  0x38   :  { %v128_v25 = vpop.eup %127  ;;  %v62_v26 = vadd.f32 1.0, %v126_v24 }
  0x39   :  { %v63_v27 = vadd.f32 1.0, %v128_v25 }
  0x3a   :  { %133 = vlog2.f32 %v62_v26 }
  0x3b   :  { %135 = vlog2.f32 %v63_v27 }
  0x3e   :  { %v130_v28 = vpop.eup %129 }
  0x3f   :  { %v132_v29 = vpop.eup %131  ;;  %v84_v30 = vadd.f32 1.0, %v130_v28 }
  0x40   :  { %v85_v31 = vadd.f32 1.0, %v132_v29 }
  0x41   :  { %137 = vrcp.f32 %v84_v30 }
  0x42   :  { %139 = vrcp.f32 %v85_v31 }
  0x44   :  { %v134_v36 = vpop.eup %133 }
  0x45   :  { %v136_v39 = vpop.eup %135  ;;  %v65_v41 = vmul.f32 0.6931472, %v134_v36 }
  0x46   :  { %v67_v43 = vmul.f32 0.6931472, %v136_v39 }
  0x47   :  { %v68_v47 = vadd.f32 %v65_v41, %v60_v40 }
  0x48   :  { %v69_v49 = vadd.f32 %v67_v43, %v61_v42 }
  0x4b   :  { %v138_v44 = vpop.eup %137 }
  0x4c   :  { %v140_v45 = vpop.eup %139  ;;  %v92_v46 = vmul.f32 %v138_v44, %v130_v28 }
  0x4d   :  { %v93_v48 = vmul.f32 %v140_v45, %v132_v29 }
  0x4e   :  { %v94_v50 = vsel %vm90_vm0, %v138_v44, %v92_v46 }
  0x4f   :  { %v95_v51 = vsel %vm91_vm1, %v140_v45, %v93_v48  ;;  %v96_v52 = vmul.f32 %v94_v50, %v94_v50 }
  0x50   :  { %v97_v53 = vmul.f32 %v95_v51, %v95_v51 }
  0x51   :  { %v98_v54 = vmul.f32 %v96_v52, %v68_v47 }
  0x52   :  { %v99_v55 = vmul.f32 %v97_v53, %v69_v49 }
  0x54   :  { %v100_v56 = vadd.f32 %v99_v55, %v98_v54 }
  0x56   :  { %101 = vst [vmem:[#allocation7] sm:$0xff] %v100_v56 }
  0x57   :  { %196 = shalt.err (!%p193_p6)
}
  0x58   :  { %s197_s10 = scalar_lea.hbm %s271_s2, 128 }
  0x59   :  { %p198_p7 = scmp.ne.s32.totalorder %s271_s2, %s197_s10  ;;  %p201_p8 = scmp.lt.u32.totalorder %s197_s10, %s271_s2 }
  0x5b   :  { %p203_p9 = pnand %p201_p8, %p198_p7 }
  0x5d   :  { %206 = shalt.err (!%p203_p9)
}
  0x5e   :  { %111 = dma.vmem_to_hbm [thread:$0]  %s109_s6, 128, %s271_s2, [#allocation4]  }
  0x5f   :  { %211 = dma.done.wait [#allocation4], 128  }
  0x60   :  { %212 = vsyncadd [#allocation4], 4294967168 }
  0x61   :  { %115 = vsyncpa [#allocation3], 1 }
  0x62   :  { %116 = vsyncpa [#allocation6], 1 }
  0x63   :  { %117 = vsyncpa [#allocation4], 1 }

</bundles_post_ra>
